<compile_context>
chip_gen: v6e
topology: v6e:2x2x1
jax: 0.10.0
libtpu: 0.0.40
codegen_flags: <defaults>
</compile_context>

<pallas_src>
import jax
import jax.numpy as jnp
from jax.experimental import pallas as pl
from jax.experimental.pallas import tpu as pltpu

LANES = 128               # vreg lane width: last dim of every block
ROW_BLOCK = 2048          # (2048, 128) f32 tile = 1 MiB; in+out double-buffered = 4 MiB
SMALL_N_THRESHOLD = 8192  # below this, XLA fusion beats Pallas launch overhead


def affine_kernel(w_ref, b_ref, x_ref, o_ref):
    # w_ref, b_ref: (1,) scalars in SMEM; x_ref / o_ref: (row_block, 128) VMEM tiles.
    o_ref[...] = w_ref[0] * x_ref[...] + b_ref[0]


def regression_forward_pallas(x, w, b):
    """Pallas implementation of RegressionModel.forward (w * x + b).

    x: any shape, float32 (module uses (N, 1));  w, b: (1,) float32.
    Returns an array of x's shape equal to w * x + b.
    """
    orig_shape = x.shape
    n_elems = x.size

    rows = pl.cdiv(n_elems, LANES)
    padded_elems = rows * LANES
    needs_pad = padded_elems != n_elems      # static (shape known at trace time)

    flat = x.reshape(-1)
    if needs_pad:
        # Only for sizes that are not a multiple of 128: pad the tail (<128 elems)
        # so the array views as whole 128-lane rows.
        flat = jnp.pad(flat, (0, padded_elems - n_elems))
    x2d = flat.reshape(rows, LANES)          # lane-dense view; no copy when aligned

    # Block rows: full extent if it fits in one tile (allowed even when not a
    # multiple of 8), otherwise ROW_BLOCK (a multiple of 8).  The grid may have a
    # partial final block; Pallas masks the boundary reads/writes.
    row_block = ROW_BLOCK if rows > ROW_BLOCK else rows
    grid = (pl.cdiv(rows, row_block),)

    out2d = pl.pallas_call(
        affine_kernel,
        out_shape=jax.ShapeDtypeStruct((rows, LANES), x.dtype),
        grid=grid,
        in_specs=[
            pl.BlockSpec(memory_space=pltpu.SMEM),                # w scalar
            pl.BlockSpec(memory_space=pltpu.SMEM),                # b scalar
            pl.BlockSpec((row_block, LANES), lambda i: (i, 0)),   # x row tile
        ],
        out_specs=pl.BlockSpec((row_block, LANES), lambda i: (i, 0)),
        compiler_params=pltpu.CompilerParams(
            dimension_semantics=("parallel",),  # independent row tiles
        ),
    )(w, b, x2d)

    if needs_pad:
        return out2d.reshape(-1)[:n_elems].reshape(orig_shape)
    return out2d.reshape(orig_shape)


def regression_forward(x, w, b):
    """Dispatch: tiny inputs go to plain JAX (XLA fuses the affine for free)."""
    if x.size < SMALL_N_THRESHOLD:
        return w * x + b
    return regression_forward_pallas(x, w, b)


if __name__ == "__main__":
    key = jax.random.PRNGKey(0)
    kw, kb, kx1, kx2 = jax.random.split(key, 4)

    # Deterministic parameter init (shapes from nn.Parameter(torch.randn(1))).
    w = jax.random.normal(kw, (1,), dtype=jnp.float32)
    b = jax.random.normal(kb, (1,), dtype=jnp.float32)

    # 1) The module's own tiny input: x = tensor([...]).view(-1, 1).
    #    Force the Pallas path so the kernel itself is exercised at N=5
    #    (exercises the pad + single-partial-row path).
    x_small = jnp.array([5.0, 7.0, 12.0, 16.0, 20.0], dtype=jnp.float32).reshape(-1, 1)
    out_small = jax.block_until_ready(regression_forward_pallas(x_small, w, b))
    ref_small = w * x_small + b
    assert out_small.shape == x_small.shape
    assert jnp.allclose(out_small, ref_small, atol=1e-6, rtol=1e-6)

    # 2) 128-aligned input: zero-copy wrapper (no pad, no slice), multi-tile grid
    #    with a partial final block (4099 rows -> grid of 3 tiles of 2048 rows).
    n_aligned = (2 * ROW_BLOCK + 3) * LANES
    x_big = jax.random.normal(kx1, (n_aligned, 1), dtype=jnp.float32)
    out_big = jax.block_until_ready(regression_forward(x_big, w, b))
    ref_big = w * x_big + b
    assert out_big.shape == x_big.shape
    assert jnp.allclose(out_big, ref_big, atol=1e-5, rtol=1e-5)

    # 3) Non-128-multiple large input: exercises the tail-pad path + partial block.
    n_tail = ROW_BLOCK * LANES + 77
    x_tail = jax.random.normal(kx2, (n_tail, 1), dtype=jnp.float32)
    out_tail = jax.block_until_ready(regression_forward(x_tail, w, b))
    ref_tail = w * x_tail + b
    assert out_tail.shape == x_tail.shape
    assert jnp.allclose(out_tail, ref_tail, atol=1e-5, rtol=1e-5)

    print("KERNEL_OK")
</pallas_src>

<mosaic_0001>
module attributes {stable_mosaic.version = 11 : i64} {
  func.func @affine_kernel(%arg0: i32, %arg1: memref<1xf32, #tpu.memory_space<smem>>, %arg2: memref<1xf32, #tpu.memory_space<smem>>, %arg3: memref<1x128xf32, #tpu.memory_space<vmem>>, %arg4: memref<1x128xf32, #tpu.memory_space<vmem>>) attributes {dimension_semantics = [#tpu.dimension_semantics<parallel>], iteration_bounds = array<i64: 1>, scalar_prefetch = 0 : i64, scratch_operands = 0 : i64, tpu.core_type = #tpu.core_type<tc>, window_params = [{transform_indices = @transform_0, window_bounds = array<i64: 1>}, {transform_indices = @transform_1, window_bounds = array<i64: 1>}, {transform_indices = @transform_2, window_bounds = array<i64: 1, 128>}, {transform_indices = @transform_3, window_bounds = array<i64: 1, 128>}]} {
    %c0 = arith.constant 0 : index
    %0 = memref.load %arg1[%c0] : memref<1xf32, #tpu.memory_space<smem>>
    %c0_0 = arith.constant 0 : index
    %c0_1 = arith.constant 0 : index
    %1 = vector.load %arg3[%c0_0, %c0_1] : memref<1x128xf32, #tpu.memory_space<vmem>>, vector<1x128xf32>
    %2 = vector.broadcast %0 : f32 to vector<1x128xf32>
    %3 = arith.mulf %2, %1 : vector<1x128xf32>
    %c0_2 = arith.constant 0 : index
    %4 = memref.load %arg2[%c0_2] : memref<1xf32, #tpu.memory_space<smem>>
    %5 = vector.broadcast %4 : f32 to vector<1x128xf32>
    %6 = arith.addf %3, %5 : vector<1x128xf32>
    %c0_3 = arith.constant 0 : index
    %c0_4 = arith.constant 0 : index
    %7 = vector.load %arg4[%c0_3, %c0_4] : memref<1x128xf32, #tpu.memory_space<vmem>>, vector<1x128xf32>
    tpu.vector_store %arg4[%c0_3, %c0_4], %6 {strides = array<i32>} : memref<1x128xf32, #tpu.memory_space<vmem>>, vector<1x128xf32>,
    return
  }
  func.func @transform_0(%arg0: i32) -> i32 {
    %c0_i32 = arith.constant 0 : i32
    %c0_i32_0 = arith.constant 0 : i32
    return %c0_i32 : i32
  }
  func.func @transform_1(%arg0: i32) -> i32 {
    %c0_i32 = arith.constant 0 : i32
    %c0_i32_0 = arith.constant 0 : i32
    return %c0_i32 : i32
  }
  func.func @transform_2(%arg0: i32) -> (i32, i32) {
    %c0_i32 = arith.constant 0 : i32
    %c0_i32_0 = arith.constant 0 : i32
    return %arg0, %c0_i32 : i32, i32
  }
  func.func @transform_3(%arg0: i32) -> (i32, i32) {
    %c0_i32 = arith.constant 0 : i32
    %c0_i32_0 = arith.constant 0 : i32
    return %arg0, %c0_i32 : i32, i32
  }
}

</mosaic_0001>

<bundles_post_ra>
// kernel: tpu_custom_call.1
= control target key start
LH: loop header
LB: loop body
LE: loop exit
PB: predicated region body
PF: predicated region fallthrough
CT: control target
= control target key end

     0   :  { %s95_s0 = inlined_call_operand.<no memory space> [shape: f32[1], index: 0, kind: input, shape index: {}]   ;;  %s96_s1 = inlined_call_operand.<no memory space> [shape: f32[1], index: 1, kind: input, shape index: {}]   ;;  %s97_s2 = inlined_call_operand.vmem [shape: f32[1,128], index: 2, kind: input, shape index: {}]   ;;  %s98_s3 = inlined_call_operand.hbm [shape: f32[1,128], index: 3, kind: output, shape index: {}]  }
   0x1   :  { %v18_v0 = vld [vmem:[%s97_s2] sm:$0x1]  ;;  %v19_v1 = vstv %s95_s0  ;;  %v22_v2 = vstv %s96_s1 }
   0x2   :  { %10 = vsyncpa [#allocation5], 0  ;;  %v20_v3 = vmul.f32 %v19_v1, %v18_v0  ;;  %s62_s18 = smov [#allocation4]  }
   0x3   :  { %s31_s19 = sshll.u32 %s62_s18, 4  ;;  %s32_s19 = int_to_ptr.vmem [resolvable:$true] %s31_s19 }
   0x4   :  { %v23_v4 = vadd.f32 %v22_v2, %v20_v3  ;;  %s40_s20 = scalar_lea.vmem %s32_s19, 16  ;;  %s44_s21 = scalar_lea.vmem %s32_s19, 32 }
   0x5   :  { %p41_p0 = scmp.ne.s32.totalorder %s32_s19, %s40_s20  ;;  %p45_p1 = scmp.lt.s32.totalorder %s32_s19, %s32_s19 }
   0x6   :  { %24 = vst [vmem:[#allocation4] sm:$0x1] %v23_v4  ;;  %p46_p2 = scmp.lt.s32.totalorder %s44_s21, %s40_s20 }
   0x8   :  { %p47_p3 = por %p46_p2, %p45_p1 }
   0xa   :  { %p48_p4 = pnand %p47_p3, %p41_p0 }
   0xc   :  { %51 = shalt.err (!%p48_p4)
}
   0xd   :  { %34 = dma.vmem_to_hbm [thread:$0]  %s32_s19, 16, %s98_s3, [#allocation5]  }
   0xe   :  { %60 = dma.done.wait [#allocation5], 16  }
   0xf   :  { %61 = vsyncadd [#allocation5], 4294967280 }
  0x10   :  { %38 = vsyncpa [#allocation5], 1 }

</bundles_post_ra>
